<compile_context>
chip_gen: v5e
topology: v5e:2x2
jax: 0.10.0
libtpu: 0.0.40
codegen_flags: <defaults>
</compile_context>

<pallas_src>
import functools

import jax
import jax.numpy as jnp
from jax.experimental import pallas as pl
from jax.experimental.pallas import tpu as pltpu

BN_EPS = 1e-5
WIDTH = 128          # lane width of every packed slab (full vreg lane dim)


# ----------------------------------------------------------------------------
# Kernel
# ----------------------------------------------------------------------------
def vae_encoder_kernel(a_ref, w_ref, v_ref, z_ref):
    """a_ref: (B, W) f32  packed [x | 0 | eps | 0]
       w_ref: (3W, W) bf16 packed [W1p ; W2p ; WHp]
       v_ref: (8, W)  f32  rows: g1, be1, g2, be2, head-bias, 0, 0, 0
       z_ref: (B, W)  f32  lanes [0, latent) hold z, rest is don't-care."""
    B, width = a_ref.shape
    inv_b = 1.0 / float(B)

    a = a_ref[...]                                    # f32, reused by the tail
    w1 = w_ref[0 * width:1 * width, :]                # slab lanes -> hidden1
    w2 = w_ref[1 * width:2 * width, :]                # hidden1    -> hidden2
    wh = w_ref[2 * width:3 * width, :]                # hidden2    -> [mean | .5*logvar]

    g1, be1 = v_ref[0:1, :], v_ref[1:2, :]            # BN1 gamma / beta (padded)
    g2, be2 = v_ref[2:3, :], v_ref[3:4, :]            # BN2 gamma / beta (padded)
    bh = v_ref[4:5, :]                                # head bias [bm | 0 | .5*bv | 0]

    def hidden_layer(h_in, w, gamma, beta):
        # Linear (bias omitted: exactly cancelled by the BN mean subtraction).
        h = jnp.dot(h_in.astype(jnp.bfloat16), w,
                    preferred_element_type=jnp.float32)
        # Two-pass BatchNorm statistics (training mode, biased variance).
        mu = jnp.sum(h, axis=0, keepdims=True) * inv_b
        c = h - mu
        var = jnp.sum(c * c, axis=0, keepdims=True) * inv_b
        scale = gamma * jax.lax.rsqrt(var + BN_EPS)   # fused affine
        return jnp.maximum(c * scale + beta, 0.0)     # ReLU
        # (Padded lanes stay exactly zero: h=0 -> c=0 -> 0*scale + 0 = 0.)

    h = hidden_layer(a, w1, g1, be1)
    h = hidden_layer(h, w2, g2, be2)

    # Fused head: lanes [0,L) = mean, lanes [W/2, W/2+L) = 0.5*log_var, rest 0.
    head = jnp.dot(h.astype(jnp.bfloat16), wh,
                   preferred_element_type=jnp.float32) + bh
    std_packed = jnp.exp(head)        # std = exp(0.5*log_var) in lanes [W/2, W/2+L)
    prod = a * std_packed             # eps * std in lanes [W/2, W/2+L)
    # roll by W/2 is its own inverse mod W, so the rotate direction is moot:
    # eps*std lands on the mean lanes -> z = mean + eps*std in lanes [0, L).
    z_ref[...] = head + pltpu.roll(prod, shift=width // 2, axis=1)


# ----------------------------------------------------------------------------
# Wrapper
# ----------------------------------------------------------------------------
def vae_encoder_forward(a_slab, w_slab, v_slab, latent_dim):
    """Whole encoder forward in one gridless pallas_call (everything fits in
    VMEM; full-array blocks, lane-dense 128-wide output)."""
    B, width = a_slab.shape
    z_wide = pl.pallas_call(
        vae_encoder_kernel,
        out_shape=jax.ShapeDtypeStruct((B, width), jnp.float32),
        in_specs=[pl.BlockSpec(memory_space=pltpu.MemorySpace.VMEM)] * 3,
        out_specs=pl.BlockSpec(memory_space=pltpu.MemorySpace.VMEM),
    )(a_slab, w_slab, v_slab)
    return z_wide[:, :latent_dim]


# ----------------------------------------------------------------------------
# Parameters (PyTorch-equivalent), done once at init time
# ----------------------------------------------------------------------------
def xavier_uniform(key, fan_in, fan_out):
    # torch.nn.init.xavier_uniform_ (gain=1): U(-a, a), a = sqrt(6/(fan_in+fan_out)).
    # PyTorch weight is (out, in); we return the (in, out) transpose directly.
    a = jnp.sqrt(6.0 / (fan_in + fan_out))
    return jax.random.uniform(key, (fan_in, fan_out), jnp.float32, -a, a)


def make_params(key, input_dim, hidden_dims, latent_dim):
    h1, h2 = hidden_dims
    keys = jax.random.split(key, 4)
    w1 = xavier_uniform(keys[0], input_dim, h1)
    b1 = jnp.full((1, h1), 0.01, jnp.float32)          # layer.bias.data.fill_(0.01)
    g1 = jnp.ones((1, h1), jnp.float32)                 # BatchNorm gamma
    be1 = jnp.zeros((1, h1), jnp.float32)                # BatchNorm beta
    w2 = xavier_uniform(keys[1], h1, h2)
    b2 = jnp.full((1, h2), 0.01, jnp.float32)
    g2 = jnp.ones((1, h2), jnp.float32)
    be2 = jnp.zeros((1, h2), jnp.float32)
    wm = xavier_uniform(keys[2], h2, latent_dim)
    bm = jnp.zeros((1, latent_dim), jnp.float32)
    wv = xavier_uniform(keys[3], h2, latent_dim)
    bv = jnp.zeros((1, latent_dim), jnp.float32)
    return (w1, b1, g1, be1, w2, b2, g2, be2, wm, bm, wv, bv)


def pack_params(params, input_dim, hidden_dims, latent_dim,
                width=WIDTH, weight_dtype=jnp.bfloat16):
    """One-time packing of the small tensors into two 128-lane-dense slabs.

    Weight slab (3*width, width), bf16:
      rows [0,       width)  : W1p  — rows [0,input_dim) = w1, rest 0
      rows [width, 2*width)  : W2p  — rows [0,h1)        = w2, rest 0
      rows [2*width,3*width) : WHp  — rows [0,h2) cols [0,L) = wm,
                                       cols [width/2, width/2+L) = 0.5*wv
    Vector slab (8, width), f32:
      rows 0..3: gamma1, beta1, gamma2, beta2 (zero-padded lanes)
      row  4   : head bias [bm | 0 | 0.5*bv | 0];  rows 5..7: zero
    Hidden-layer Linear biases b1/b2 are NOT packed (cancelled by the
    training-mode BatchNorm mean subtraction)."""
    (w1, b1, g1, be1, w2, b2, g2, be2, wm, bm, wv, bv) = params
    del b1, b2  # cancelled by BN
    h1, h2 = hidden_dims
    assert h1 <= width and h2 <= width
    assert input_dim <= width // 2, "x lanes must not overlap the eps lanes"
    assert latent_dim <= width // 2, "mean/log-var blocks must each fit half a vreg"
    eps_off = width // 2

    W1p = jnp.zeros((width, width), jnp.float32).at[:input_dim, :h1].set(w1)
    W2p = jnp.zeros((width, width), jnp.float32).at[:h1, :h2].set(w2)
    WHp = jnp.zeros((width, width), jnp.float32)
    WHp = WHp.at[:h2, :latent_dim].set(wm)
    WHp = WHp.at[:h2, eps_off:eps_off + latent_dim].set(0.5 * wv)   # fold 0.5 once
    w_slab = jnp.concatenate([W1p, W2p, WHp], axis=0).astype(weight_dtype)

    v = jnp.zeros((8, width), jnp.float32)
    v = v.at[0, :h1].set(g1[0])
    v = v.at[1, :h1].set(be1[0])
    v = v.at[2, :h2].set(g2[0])
    v = v.at[3, :h2].set(be2[0])
    v = v.at[4, :latent_dim].set(bm[0])
    v = v.at[4, eps_off:eps_off + latent_dim].set(0.5 * bv[0])
    return w_slab, v


def pack_activations(x, eps, input_dim, latent_dim, width=WIDTH):
    """Per-call packing of x and the N(0,1) noise into one lane-dense slab."""
    B = x.shape[0]
    a = jnp.zeros((B, width), jnp.float32)
    a = a.at[:, :input_dim].set(x)
    a = a.at[:, width // 2:width // 2 + latent_dim].set(eps)
    return a


# ----------------------------------------------------------------------------
# Pure-JAX reference (mirrors the PyTorch forward; matmul operands are
# quantized to bf16 exactly like the kernel's MXU policy, everything else f32)
# ----------------------------------------------------------------------------
def _mm_bf16(a, w):
    return jnp.dot(a.astype(jnp.bfloat16).astype(jnp.float32),
                   w.astype(jnp.bfloat16).astype(jnp.float32))


def reference_forward(x, params, eps):
    (w1, b1, g1, be1, w2, b2, g2, be2, wm, bm, wv, bv) = params

    def layer(h, w, b, g, be):
        h = _mm_bf16(h, w) + b
        mu = h.mean(0, keepdims=True)
        var = ((h - mu) ** 2).mean(0, keepdims=True)
        h = (h - mu) / jnp.sqrt(var + BN_EPS) * g + be
        return jnp.maximum(h, 0.0)

    h = layer(x, w1, b1, g1, be1)
    h = layer(h, w2, b2, g2, be2)
    mean = _mm_bf16(h, wm) + bm
    log_var = _mm_bf16(h, wv) + bv
    return mean + eps * jnp.exp(0.5 * log_var)


if __name__ == "__main__":
    input_dim, hidden_dims, latent_dim = 32, [64, 64], 16
    batch = 8

    root = jax.random.PRNGKey(0)
    k_x, k_p, k_eps = jax.random.split(root, 3)

    x = jax.random.normal(k_x, (batch, input_dim), jnp.float32)
    params = make_params(k_p, input_dim, hidden_dims, latent_dim)
    eps = jax.random.normal(k_eps, (batch, latent_dim), jnp.float32)  # randn_like

    # One-time parameter packing (init-time) + per-call activation packing.
    w_slab, v_slab = pack_params(params, input_dim, hidden_dims, latent_dim)
    a_slab = pack_activations(x, eps, input_dim, latent_dim)

    z = vae_encoder_forward(a_slab, w_slab, v_slab, latent_dim)
    jax.block_until_ready(z)
    assert z.shape == (batch, latent_dim)

    # Tolerance: both paths use bf16 matmul operands with f32 accumulation, so
    # typical disagreement is ~1e-5; the margin covers rare bf16 rounding-flip
    # differences on the independently-computed intermediate activations.
    z_ref = reference_forward(x, params, eps)
    assert jnp.allclose(z, z_ref, atol=5e-2, rtol=5e-2), "mismatch vs reference"

    print("KERNEL_OK")
</pallas_src>

<mosaic_0001>
module attributes {stable_mosaic.version = 11 : i64} {
  func.func @vae_encoder_kernel(%arg0: memref<8x128xf32, #tpu.memory_space<vmem>>, %arg1: memref<384x128xbf16, #tpu.memory_space<vmem>>, %arg2: memref<8x128xf32, #tpu.memory_space<vmem>>, %arg3: memref<8x128xf32, #tpu.memory_space<vmem>>) attributes {dimension_semantics = [], scalar_prefetch = 0 : i64, scratch_operands = 0 : i64, tpu.core_type = #tpu.core_type<tc>} {
    %c0 = arith.constant 0 : index
    %c0_0 = arith.constant 0 : index
    %0 = vector.load %arg0[%c0, %c0_0] : memref<8x128xf32, #tpu.memory_space<vmem>>, vector<8x128xf32>
    %c0_1 = arith.constant 0 : index
    %c0_2 = arith.constant 0 : index
    %1 = vector.load %arg1[%c0_1, %c0_2] : memref<384x128xbf16, #tpu.memory_space<vmem>>, vector<128x128xbf16>
    %c128 = arith.constant 128 : index
    %c0_3 = arith.constant 0 : index
    %2 = vector.load %arg1[%c128, %c0_3] : memref<384x128xbf16, #tpu.memory_space<vmem>>, vector<128x128xbf16>
    %c256 = arith.constant 256 : index
    %c0_4 = arith.constant 0 : index
    %3 = vector.load %arg1[%c256, %c0_4] : memref<384x128xbf16, #tpu.memory_space<vmem>>, vector<128x128xbf16>
    %c0_5 = arith.constant 0 : index
    %c0_6 = arith.constant 0 : index
    %4 = vector.load %arg2[%c0_5, %c0_6] : memref<8x128xf32, #tpu.memory_space<vmem>>, vector<1x128xf32>
    %c1 = arith.constant 1 : index
    %c0_7 = arith.constant 0 : index
    %5 = vector.load %arg2[%c1, %c0_7] : memref<8x128xf32, #tpu.memory_space<vmem>>, vector<1x128xf32>
    %c2 = arith.constant 2 : index
    %c0_8 = arith.constant 0 : index
    %6 = vector.load %arg2[%c2, %c0_8] : memref<8x128xf32, #tpu.memory_space<vmem>>, vector<1x128xf32>
    %c3 = arith.constant 3 : index
    %c0_9 = arith.constant 0 : index
    %7 = vector.load %arg2[%c3, %c0_9] : memref<8x128xf32, #tpu.memory_space<vmem>>, vector<1x128xf32>
    %c4 = arith.constant 4 : index
    %c0_10 = arith.constant 0 : index
    %8 = vector.load %arg2[%c4, %c0_10] : memref<8x128xf32, #tpu.memory_space<vmem>>, vector<1x128xf32>
    %9 = arith.truncf %0 : vector<8x128xf32> to vector<8x128xbf16>
    %cst = arith.constant dense<0.000000e+00> : vector<8x128xf32>
    %10 = tpu.matmul %9, %1, %cst {dimension_numbers = #tpu.dot_dimension_numbers<[1], [0], [0], [1], [0, 0, 1, 1], [], []>} : vector<8x128xbf16>, vector<128x128xbf16>, vector<8x128xf32> -> vector<8x128xf32>
    %cst_11 = arith.constant dense<0.000000e+00> : vector<128xf32>
    %11 = vector.multi_reduction <add>, %10, %cst_11 [0] : vector<8x128xf32> to vector<128xf32>
    %12 = vector.shape_cast %11 : vector<128xf32> to vector<1x128xf32>
    %cst_12 = arith.constant 1.250000e-01 : f32
    %13 = vector.broadcast %cst_12 : f32 to vector<1x128xf32>
    %14 = arith.mulf %12, %13 : vector<1x128xf32>
    %15 = vector.broadcast %14 : vector<1x128xf32> to vector<8x128xf32>
    %16 = arith.subf %10, %15 : vector<8x128xf32>
    %17 = arith.mulf %16, %16 : vector<8x128xf32>
    %cst_13 = arith.constant dense<0.000000e+00> : vector<128xf32>
    %18 = vector.multi_reduction <add>, %17, %cst_13 [0] : vector<8x128xf32> to vector<128xf32>
    %19 = vector.shape_cast %18 : vector<128xf32> to vector<1x128xf32>
    %cst_14 = arith.constant 1.250000e-01 : f32
    %20 = vector.broadcast %cst_14 : f32 to vector<1x128xf32>
    %21 = arith.mulf %19, %20 : vector<1x128xf32>
    %cst_15 = arith.constant 9.99999974E-6 : f32
    %22 = vector.broadcast %cst_15 : f32 to vector<1x128xf32>
    %23 = arith.addf %21, %22 : vector<1x128xf32>
    %24 = math.rsqrt %23 : vector<1x128xf32>
    %25 = arith.mulf %4, %24 : vector<1x128xf32>
    %26 = vector.broadcast %25 : vector<1x128xf32> to vector<8x128xf32>
    %27 = arith.mulf %16, %26 : vector<8x128xf32>
    %28 = vector.broadcast %5 : vector<1x128xf32> to vector<8x128xf32>
    %29 = arith.addf %27, %28 : vector<8x128xf32>
    %cst_16 = arith.constant 0.000000e+00 : f32
    %30 = vector.broadcast %cst_16 : f32 to vector<8x128xf32>
    %31 = arith.maximumf %29, %30 : vector<8x128xf32>
    %32 = arith.truncf %31 : vector<8x128xf32> to vector<8x128xbf16>
    %cst_17 = arith.constant dense<0.000000e+00> : vector<8x128xf32>
    %33 = tpu.matmul %32, %2, %cst_17 {dimension_numbers = #tpu.dot_dimension_numbers<[1], [0], [0], [1], [0, 0, 1, 1], [], []>} : vector<8x128xbf16>, vector<128x128xbf16>, vector<8x128xf32> -> vector<8x128xf32>
    %cst_18 = arith.constant dense<0.000000e+00> : vector<128xf32>
    %34 = vector.multi_reduction <add>, %33, %cst_18 [0] : vector<8x128xf32> to vector<128xf32>
    %35 = vector.shape_cast %34 : vector<128xf32> to vector<1x128xf32>
    %cst_19 = arith.constant 1.250000e-01 : f32
    %36 = vector.broadcast %cst_19 : f32 to vector<1x128xf32>
    %37 = arith.mulf %35, %36 : vector<1x128xf32>
    %38 = vector.broadcast %37 : vector<1x128xf32> to vector<8x128xf32>
    %39 = arith.subf %33, %38 : vector<8x128xf32>
    %40 = arith.mulf %39, %39 : vector<8x128xf32>
    %cst_20 = arith.constant dense<0.000000e+00> : vector<128xf32>
    %41 = vector.multi_reduction <add>, %40, %cst_20 [0] : vector<8x128xf32> to vector<128xf32>
    %42 = vector.shape_cast %41 : vector<128xf32> to vector<1x128xf32>
    %cst_21 = arith.constant 1.250000e-01 : f32
    %43 = vector.broadcast %cst_21 : f32 to vector<1x128xf32>
    %44 = arith.mulf %42, %43 : vector<1x128xf32>
    %cst_22 = arith.constant 9.99999974E-6 : f32
    %45 = vector.broadcast %cst_22 : f32 to vector<1x128xf32>
    %46 = arith.addf %44, %45 : vector<1x128xf32>
    %47 = math.rsqrt %46 : vector<1x128xf32>
    %48 = arith.mulf %6, %47 : vector<1x128xf32>
    %49 = vector.broadcast %48 : vector<1x128xf32> to vector<8x128xf32>
    %50 = arith.mulf %39, %49 : vector<8x128xf32>
    %51 = vector.broadcast %7 : vector<1x128xf32> to vector<8x128xf32>
    %52 = arith.addf %50, %51 : vector<8x128xf32>
    %cst_23 = arith.constant 0.000000e+00 : f32
    %53 = vector.broadcast %cst_23 : f32 to vector<8x128xf32>
    %54 = arith.maximumf %52, %53 : vector<8x128xf32>
    %55 = arith.truncf %54 : vector<8x128xf32> to vector<8x128xbf16>
    %cst_24 = arith.constant dense<0.000000e+00> : vector<8x128xf32>
    %56 = tpu.matmul %55, %3, %cst_24 {dimension_numbers = #tpu.dot_dimension_numbers<[1], [0], [0], [1], [0, 0, 1, 1], [], []>} : vector<8x128xbf16>, vector<128x128xbf16>, vector<8x128xf32> -> vector<8x128xf32>
    %57 = vector.broadcast %8 : vector<1x128xf32> to vector<8x128xf32>
    %58 = arith.addf %56, %57 : vector<8x128xf32>
    %59 = math.exp %58 : vector<8x128xf32>
    %60 = arith.mulf %0, %59 : vector<8x128xf32>
    %c64_i32 = arith.constant 64 : i32
    %61 = tpu.dynamic_rotate %60 by %c64_i32 dim 1 : vector<8x128xf32>, i32 -> vector<8x128xf32>
    %62 = arith.addf %58, %61 : vector<8x128xf32>
    %c0_25 = arith.constant 0 : index
    %c0_26 = arith.constant 0 : index
    %63 = vector.load %arg3[%c0_25, %c0_26] : memref<8x128xf32, #tpu.memory_space<vmem>>, vector<8x128xf32>
    tpu.vector_store %arg3[%c0_25, %c0_26], %62 {strides = array<i32>} : memref<8x128xf32, #tpu.memory_space<vmem>>, vector<8x128xf32>,
    return
  }
}

</mosaic_0001>

<bundles_post_ra>
// kernel: tpu_custom_call.1
= control target key start
LH: loop header
LB: loop body
LE: loop exit
PB: predicated region body
PF: predicated region fallthrough
CT: control target
= control target key end

     0   :  { %8 = vsyncpa [#allocation3], 0  ;;  %s673_s0 = inlined_call_operand.hbm [shape: f32[8,128], index: 0, kind: input, shape index: {}]   ;;  %s674_s1 = inlined_call_operand.hbm [shape: bf16[384,128], index: 1, kind: input, shape index: {}]   ;;  %s675_s2 = inlined_call_operand.hbm [shape: f32[8,128], index: 2, kind: input, shape index: {}]   ;;  %s676_s3 = inlined_call_operand.hbm [shape: f32[8,128], index: 3, kind: output, shape index: {}]  }
   0x1   :  { %9 = vsyncpa [#allocation6], 0  ;;  %s26_s14 = sshll.u32 %s674_s1, 4  ;;  %s27_s14 = int_to_ptr.hbm [resolvable:$true] %s26_s14 }
   0x2   :  { %10 = vsyncpa [#allocation4], 0  ;;  %s627_s15 = smov [#allocation5]   ;;  %s16_s19 = sshll.u32 %s673_s0, 4  ;;  %s17_s19 = int_to_ptr.hbm [resolvable:$true] %s16_s19 }
   0x3   :  { %s28_s16 = sshll.u32 %s627_s15, 4  ;;  %s628_s20 = smov 64   ;;  %s29_s16 = int_to_ptr.vmem [resolvable:$true] %s28_s16 }
   0x4   :  { %s629_s21 = smov 4   ;;  %s630_s22 = smov [#allocation2]  }
   0x5   :  { %34 = dma.hbm_to_vmem [thread:$0]  %s27_s14, 3072, %s29_s16, [#allocation6], %s628_s20, %s628_s20, %s629_s21  }
   0x6   :  { %s18_s23 = sshll.u32 %s630_s22, 4  ;;  %s40_s1 = sshll.u32 %s675_s2, 4  ;;  %s19_s23 = int_to_ptr.vmem [resolvable:$true] %s18_s23  ;;  %s41_s1 = int_to_ptr.hbm [resolvable:$true] %s40_s1 }
   0x7   :  { %21 = dma.hbm_to_vmem [thread:$0]  %s17_s19, 128, %s19_s23, [#allocation3]  }
   0x8   :  { %s631_s26 = smov [#allocation7]  }
   0x9   :  { %s42_s27 = sshll.u32 %s631_s26, 4  ;;  %s43_s27 = int_to_ptr.vmem [resolvable:$true] %s42_s27 }
   0xa   :  { %45 = dma.hbm_to_vmem [thread:$0]  %s41_s1, 128, %s43_s27, [#allocation6]  }
   0xb   :  { %621 = dma.done.wait [#allocation3], 128  }
   0xc   :  { %622 = vsyncadd [#allocation3], 4294967168 }
   0xd   :  { %623 = dma.done.wait [#allocation6], 3200  }
   0xe   :  { %624 = vsyncadd [#allocation6], 4294964096  ;;  %v493_v0 = vld [vmem:[#allocation5 + $0x38] sm:$0xff]  ;;  %v492_v1 = vld [vmem:[#allocation5 + $0x30] sm:$0xff]  ;;  %s632_s0 = smov [#allocation8]   ;;  %s379_s30 = sshll.u32 %s676_s3, 4  ;;  %s380_s30 = int_to_ptr.hbm [resolvable:$true] %s379_s30 }
   0xf   :  { %161 = vmatpush.bf16.msra.mxu0 %v493_v0  ;;  %v491_v2 = vld [vmem:[#allocation5 + $0x28] sm:$0xff]  ;;  %v490_v3 = vld [vmem:[#allocation5 + $0x20] sm:$0xff]  ;;  %v489_v4 = vld [vmem:[#allocation5 + $0x18] sm:$0xff]  ;;  %s377_s2 = sshll.u32 %s632_s0, 4  ;;  %s378_s2 = int_to_ptr.vmem [resolvable:$true] %s377_s2 }
  0x10   :  { %v488_v5 = vld [vmem:[#allocation5 + $0x10] sm:$0xff]  ;;  %v487_v6 = vld [vmem:[#allocation5 + $0x8] sm:$0xff]  ;;  %v486_v7 = vld [vmem:[#allocation5] sm:$0xff] }
  0x11   :  { %v664_v8 = vld [vmem:[#allocation2] sm:$0xff]  ;;  %v500_v14 = vld [vmem:[#allocation5 + $0x70] sm:$0xff]  ;;  %v499_v18 = vld [vmem:[#allocation5 + $0x68] sm:$0xff] }
  0x12   :  { %v112_v9 = vpack.c.bf16 %v664_v8, %v664_v8  ;;  %v501_v11 = vld [vmem:[#allocation5 + $0x78] sm:$0xff]  ;;  %v498_v20 = vld [vmem:[#allocation5 + $0x60] sm:$0xff]  ;;  %v496_v26 = vld [vmem:[#allocation5 + $0x50] sm:$0xff] }
  0x13   :  { %162 = vmatpush.bf16.msra.mxu0 %v492_v1  ;;  %256 = vmatpush.bf16.msra.mxu1 %v501_v11  ;;  %v497_v23 = vld [vmem:[#allocation5 + $0x58] sm:$0xff]  ;;  %v495_v29 = vld [vmem:[#allocation5 + $0x48] sm:$0xff]  ;;  %v494_v32 = vld [vmem:[#allocation5 + $0x40] sm:$0xff] }
  0x14   :  { %v107_v42 = vld [vmem:[#allocation7] sm:$0x1]  ;;  %v516_v47 = vld [vmem:[#allocation7 + $0x1] ss:$0 sm:$0xff]  ;;  %v509_v53 = vld [vmem:[#allocation5 + $0xb8] sm:$0xff] }
  0x15   :  { %352 = vmatpush.bf16.msra.mxu2 %v509_v53  ;;  %v508_v56 = vld [vmem:[#allocation5 + $0xb0] sm:$0xff]  ;;  %v507_v60 = vld [vmem:[#allocation5 + $0xa8] sm:$0xff]  ;;  %v506_v62 = vld [vmem:[#allocation5 + $0xa0] sm:$0xff] }
  0x16   :  { %v505_v1 = vld [vmem:[#allocation5 + $0x98] sm:$0xff]  ;;  %v502_v11 = vld [vmem:[#allocation5 + $0x80] sm:$0xff] }
  0x17   :  { %163 = vmatpush.bf16.msra.mxu0 %v491_v2  ;;  %257 = vmatpush.bf16.msra.mxu1 %v500_v14 }
  0x19   :  { %353 = vmatpush.bf16.msra.mxu2 %v508_v56 }
  0x1b   :  { %164 = vmatpush.bf16.msra.mxu0 %v490_v3  ;;  %258 = vmatpush.bf16.msra.mxu1 %v499_v18 }
  0x1d   :  { %354 = vmatpush.bf16.msra.mxu2 %v507_v60 }
  0x1f   :  { %165 = vmatpush.bf16.msra.mxu0 %v489_v4  ;;  %259 = vmatpush.bf16.msra.mxu1 %v498_v20  ;;  %v504_v4 = vld [vmem:[#allocation5 + $0x90] sm:$0xff] }
  0x21   :  { %355 = vmatpush.bf16.msra.mxu2 %v506_v62 }
  0x23   :  { %166 = vmatpush.bf16.msra.mxu0 %v488_v5  ;;  %260 = vmatpush.bf16.msra.mxu1 %v497_v23 }
  0x25   :  { %356 = vmatpush.bf16.msra.mxu2 %v505_v1 }
  0x27   :  { %167 = vmatpush.bf16.msra.mxu0 %v487_v6  ;;  %261 = vmatpush.bf16.msra.mxu1 %v496_v26  ;;  %v517_v26 = vld [vmem:[#allocation7 + $0x3] ss:$0 sm:$0xff] }
  0x29   :  { %357 = vmatpush.bf16.msra.mxu2 %v504_v4 }
  0x2b   :  { %168 = vmatpush.bf16.msra.mxu0 %v486_v7  ;;  %262 = vmatpush.bf16.msra.mxu1 %v495_v29  ;;  %v503_v7 = vld [vmem:[#allocation5 + $0x88] sm:$0xff] }
  0x2d   :  { %358 = vmatpush.bf16.msra.mxu2 %v503_v7 }
  0x2e   :  { %169 = vmatmul.bf16.vlgmr.msra.gmra.mxu0 %v112_v9 }
  0x2f   :  { %263 = vmatpush.bf16.msra.mxu1 %v494_v32 }
  0x31   :  { %359 = vmatpush.bf16.msra.mxu2 %v502_v11 }
  0xab   :  { %v170_v10 = vpop.f32.mrf.mxu0 }
  0xac   :  { %v174_v12 = vrot.slane %v170_v10, 4 }
  0xae   :  { %v175_v13 = vadd.f32 %v174_v12, %v170_v10 }
  0xb0   :  { %v176_v15 = vrot.slane %v175_v13, 2 }
  0xb2   :  { %v177_v16 = vadd.f32 %v176_v15, %v175_v13 }
  0xb3   :  { %v172_v17 = vpop.f32.mrf.mxu0 }
  0xb4   :  { %v178_v19 = vrot.slane %v177_v16, 1 }
  0xb6   :  { %v179_v21 = vadd.f32 %v178_v19, %v177_v16 }
  0xb8   :  { %v180_v22 = vmul.f32 0.125, %v179_v21  ;;  %v109_v21 = vld [vmem:[#allocation7 + $0x2] sm:$0x1] }
  0xba   :  { %v181_v24 = vsub.f32 %v170_v10, %v180_v22 }
  0xbc   :  { %v182_v25 = vmul.f32 %v181_v24, %v181_v24 }
  0xbe   :  { %v183_v27 = vrot.slane %v182_v25, 4 }
  0xc0   :  { %v184_v28 = vadd.f32 %v183_v27, %v182_v25 }
  0xc2   :  { %v185_v30 = vrot.slane %v184_v28, 2 }
  0xc4   :  { %v186_v31 = vadd.f32 %v185_v30, %v184_v28 }
  0xc6   :  { %v187_v33 = vrot.slane %v186_v31, 1 }
  0xc8   :  { %v188_v34 = vadd.f32 %v187_v33, %v186_v31  ;;  %v518_v31 = vld [vmem:[#allocation7 + $0x4] ss:$0 sm:$0xff] }
  0xca   :  { %v189_v35 = vmul.f32 0.125, %v188_v34 }
  0xcc   :  { %v190_v36 = vadd.f32 1e-05, %v189_v35 }
  0xce   :  { %519 = vrsqrt.f32 %v190_v36  ;;  %vm197_vm1 = vweird.f32 %v190_v36 }
  0xd4   :  { %v520_v37 = vpop.eup %519 }
  0xd5   :  { %v192_v38 = vmul.f32 %v520_v37, %v190_v36  ;;  %vm198_vm0 = vweird.f32 %v520_v37 }
  0xd6   :  { %vm199_vm2 = vmor %vm197_vm1, %vm198_vm0 }
  0xd7   :  { %v193_v39 = vmul.f32 %v520_v37, %v192_v38 }
  0xd9   :  { %v194_v40 = vmul.f32 0.5, %v193_v39 }
  0xdb   :  { %v195_v41 = vsub.f32 1.5, %v194_v40 }
  0xdd   :  { %v196_v43 = vmul.f32 %v520_v37, %v195_v41 }
  0xdf   :  { %v200_v44 = vsel %vm199_vm2, %v520_v37, %v196_v43 }
  0xe0   :  { %v201_v45 = vmul.f32 %v200_v44, %v107_v42 }
  0xe2   :  { %v202_v46 = vperm.slane %v201_v45, 0 }
  0xe4   :  { %v203_v48 = vmul.f32 %v202_v46, %v181_v24 }
  0xe6   :  { %v205_v49 = vadd.f32 %v516_v47, %v203_v48 }
  0xe8   :  { %v206_v50 = vmax.f32 %v205_v49, 0.0 }
  0xea   :  { %v207_v51 = vpack.c.bf16 %v206_v50, %v206_v50 }
  0xec   :  { %264 = vmatmul.bf16.vlgmr.msra.gmra.mxu1 %v207_v51 }
 0x169   :  { %v265_v52 = vpop.f32.mrf.mxu1 }
 0x16a   :  { %v269_v54 = vrot.slane %v265_v52, 4 }
 0x16c   :  { %v270_v55 = vadd.f32 %v269_v54, %v265_v52 }
 0x16e   :  { %v271_v57 = vrot.slane %v270_v55, 2 }
 0x170   :  { %v272_v58 = vadd.f32 %v271_v57, %v270_v55 }
 0x171   :  { %v267_v59 = vpop.f32.mrf.mxu1 }
 0x172   :  { %v273_v61 = vrot.slane %v272_v58, 1 }
 0x174   :  { %v274_v63 = vadd.f32 %v273_v61, %v272_v58 }
 0x176   :  { %v275_v0 = vmul.f32 0.125, %v274_v63 }
 0x178   :  { %v276_v2 = vsub.f32 %v265_v52, %v275_v0 }
 0x17a   :  { %v277_v3 = vmul.f32 %v276_v2, %v276_v2 }
 0x17c   :  { %v278_v5 = vrot.slane %v277_v3, 4 }
 0x17e   :  { %v279_v6 = vadd.f32 %v278_v5, %v277_v3 }
 0x180   :  { %v280_v9 = vrot.slane %v279_v6, 2 }
 0x182   :  { %v281_v10 = vadd.f32 %v280_v9, %v279_v6 }
 0x184   :  { %v282_v12 = vrot.slane %v281_v10, 1 }
 0x186   :  { %v283_v13 = vadd.f32 %v282_v12, %v281_v10 }
 0x188   :  { %v284_v14 = vmul.f32 0.125, %v283_v13 }
 0x18a   :  { %v285_v15 = vadd.f32 1e-05, %v284_v14 }
 0x18c   :  { %521 = vrsqrt.f32 %v285_v15  ;;  %vm292_vm4 = vweird.f32 %v285_v15 }
 0x192   :  { %v522_v16 = vpop.eup %521 }
 0x193   :  { %v287_v17 = vmul.f32 %v522_v16, %v285_v15  ;;  %vm293_vm3 = vweird.f32 %v522_v16 }
 0x194   :  { %vm294_vm5 = vmor %vm292_vm4, %vm293_vm3 }
 0x195   :  { %v288_v18 = vmul.f32 %v522_v16, %v287_v17 }
 0x197   :  { %v289_v19 = vmul.f32 0.5, %v288_v18 }
 0x199   :  { %v290_v20 = vsub.f32 1.5, %v289_v19 }
 0x19b   :  { %v291_v22 = vmul.f32 %v522_v16, %v290_v20 }
 0x19d   :  { %v295_v23 = vsel %vm294_vm5, %v522_v16, %v291_v22 }
 0x19e   :  { %v296_v24 = vmul.f32 %v295_v23, %v109_v21 }
 0x1a0   :  { %v297_v25 = vperm.slane %v296_v24, 0 }
 0x1a2   :  { %v298_v27 = vmul.f32 %v297_v25, %v276_v2 }
 0x1a4   :  { %v300_v28 = vadd.f32 %v517_v26, %v298_v27 }
 0x1a6   :  { %v301_v29 = vmax.f32 %v300_v28, 0.0 }
 0x1a8   :  { %v302_v30 = vpack.c.bf16 %v301_v29, %v301_v29 }
 0x1aa   :  { %360 = vmatmul.bf16.vlgmr.msra.gmra.mxu2 %v302_v30 }
 0x22d   :  { %v361_v32 = vpop.f32.mrf.mxu2 }
 0x22e   :  { %v362_v33 = vadd.f32 %v518_v31, %v361_v32 }
 0x230   :  { %v365_v34 = vmul.f32 1.442695, %v362_v33 }
 0x232   :  { %523 = vpow2.f32 %v365_v34 }
 0x235   :  { %v363_v35 = vpop.f32.mrf.mxu2 }
 0x238   :  { %v524_v36 = vpop.eup %523 }
 0x239   :  { %v367_v37 = vmul.f32 %v524_v36, %v664_v8 }
 0x23b   :  { %368 = vrot.lane.b32.xlu0 %v367_v37, %s628_s20 }
 0x2ad   :  { %v369_v38 = vpop.permute.xlu0 %368 }
 0x2ae   :  { %v370_v39 = vadd.f32 %v369_v38, %v362_v33 }
 0x2b0   :  { %371 = vst [vmem:[#allocation8] sm:$0xff] %v370_v39 }
 0x2b1   :  { %382 = dma.vmem_to_hbm [thread:$0]  %s378_s2, 128, %s380_s30, [#allocation4]  }
 0x2b2   :  { %625 = dma.done.wait [#allocation4], 128  }
 0x2b3   :  { %626 = vsyncadd [#allocation4], 4294967168 }
 0x2b4   :  { %387 = vsyncpa [#allocation3], 1 }
 0x2b5   :  { %388 = vsyncpa [#allocation6], 1 }
 0x2b6   :  { %389 = vsyncpa [#allocation4], 1 }

</bundles_post_ra>
